<compile_context>
chip_gen: v5e
topology: v5e:2x2
jax: 0.10.0
libtpu: 0.0.40
codegen_flags: <defaults>
</compile_context>

<pallas_src>
import jax
import jax.numpy as jnp
from jax.experimental import pallas as pl
from jax.experimental.pallas import tpu as pltpu


def time_embedding_kernel(x_ref, w1_ref, b1_ref, w2_ref, b2_ref, o_ref):
    # GEMM1 + SiLU against the resident full W1.
    # bf16 inputs, f32 accumulate on the MXU; bias + sigmoid in f32 (VPU/EUP).
    h = jnp.dot(x_ref[...], w1_ref[...], preferred_element_type=jnp.float32)
    h = h + b1_ref[...]
    h = h * jax.nn.sigmoid(h)

    # GEMM2 against this N tile of W2 (full-K contraction, no accumulator).
    y = jnp.dot(
        h.astype(w2_ref.dtype), w2_ref[...], preferred_element_type=jnp.float32
    )
    o_ref[...] = (y + b2_ref[...]).astype(o_ref.dtype)


def _choose_tn(hidden: int, budget_bytes: int = 12 << 20) -> int:
    """Pick the W2 N-tile width.

    Prefers tn = hidden/2 (2 grid steps -> both v7x TensorCores engaged) when
    it is a 128-aligned divisor and its bf16 tile fits the VMEM budget;
    otherwise the largest 128-aligned divisor that fits; else the full dim.
    """
    if hidden % 128 != 0:
        return hidden
    cands = [d for d in range(hidden, 127, -128) if hidden % d == 0]
    for d in cands:  # largest-first, but at most hidden//2
        if d <= hidden // 2 and hidden * d * 2 <= budget_bytes:
            return d
    for d in cands:  # fall back: largest 128-aligned divisor that fits
        if hidden * d * 2 <= budget_bytes:
            return d
    return hidden


def time_embedding(x, w1, b1, w2, b2):
    """x: (B, n_embed); w1: (n_embed, 4n); b1: (4n,); w2: (4n, 4n); b2: (4n,)."""
    B, n_embed = x.shape
    hidden = 4 * n_embed
    assert w1.shape == (n_embed, hidden)
    assert w2.shape == (hidden, hidden)
    out_dtype = x.dtype
    out_isize = jnp.dtype(out_dtype).itemsize

    # bf16 streaming for the (HBM-bandwidth dominating) weight traffic and x.
    x_bf = x.astype(jnp.bfloat16)
    w1_bf = w1.astype(jnp.bfloat16)
    w2_bf = w2.astype(jnp.bfloat16)
    # Biases stay f32 (tiny), 2-D so they tile cleanly in VMEM.
    b1_2d = b1.reshape(1, hidden).astype(jnp.float32)
    b2_2d = b2.reshape(1, hidden).astype(jnp.float32)

    # Pad the batch dim to a multiple of 8 sublanes -> unmasked vreg stores.
    B_pad = ((B + 7) // 8) * 8
    if B_pad != B:
        x_bf = jnp.pad(x_bf, ((0, B_pad - B), (0, 0)))

    tn = _choose_tn(hidden)
    grid_n = hidden // tn

    cost = pl.CostEstimate(
        # GEMM1 is re-done per N tile (cheap: x and W1 are tiny and resident),
        # GEMM2 is exact; W1/W2/x bytes counted once.
        flops=2 * B_pad * n_embed * hidden * grid_n + 2 * B_pad * hidden * hidden,
        transcendentals=B_pad * hidden * grid_n,  # sigmoid in SiLU
        bytes_accessed=(
            x_bf.size * 2
            + w1_bf.size * 2
            + w2_bf.size * 2
            + b1_2d.size * 4
            + b2_2d.size * 4
            + B_pad * hidden * out_isize
        ),
    )

    # VMEM budget: count everything as double-buffered (conservative) + slack.
    vmem_est = 2 * (
        B_pad * n_embed * 2          # x (bf16)
        + n_embed * hidden * 2       # W1 (bf16, resident)
        + hidden * 4                 # b1 (f32)
        + hidden * tn * 2            # W2 N-tile (bf16)
        + tn * 4                     # b2 N-tile (f32)
        + B_pad * tn * out_isize     # output N-tile
        + B_pad * hidden * 4         # intermediate h (f32)
    )
    vmem_limit = int(min(max(vmem_est + (4 << 20), 16 << 20), 64 << 20))

    grid_spec = pltpu.PrefetchScalarGridSpec(
        num_scalar_prefetch=0,
        grid=(grid_n,),
        in_specs=[
            pl.BlockSpec((B_pad, n_embed), lambda n: (0, 0)),   # x   (resident)
            pl.BlockSpec((n_embed, hidden), lambda n: (0, 0)),  # W1  (resident)
            pl.BlockSpec((1, hidden), lambda n: (0, 0)),        # b1  (resident)
            pl.BlockSpec((hidden, tn), lambda n: (0, n)),       # W2  N-tile
            pl.BlockSpec((1, tn), lambda n: (0, n)),            # b2  N-tile
        ],
        out_specs=pl.BlockSpec((B_pad, tn), lambda n: (0, n)),
    )

    out = pl.pallas_call(
        time_embedding_kernel,
        out_shape=jax.ShapeDtypeStruct((B_pad, hidden), out_dtype),
        grid_spec=grid_spec,
        compiler_params=pltpu.CompilerParams(
            dimension_semantics=("parallel",),
            vmem_limit_bytes=vmem_limit,
        ),
        cost_estimate=cost,
    )(x_bf, w1_bf, b1_2d, w2_bf, b2_2d)

    return out[:B] if B_pad != B else out


def time_embedding_ref(x, w1, b1, w2, b2):
    """Pure-JAX reference with the same bf16 weight-streaming / f32-accum recipe."""
    xb = x.astype(jnp.bfloat16)
    w1b = w1.astype(jnp.bfloat16)
    w2b = w2.astype(jnp.bfloat16)
    h = jnp.dot(xb, w1b, preferred_element_type=jnp.float32) + b1.astype(jnp.float32)
    h = h * jax.nn.sigmoid(h)
    y = jnp.dot(h.astype(jnp.bfloat16), w2b, preferred_element_type=jnp.float32)
    y = y + b2.astype(jnp.float32)
    return y.astype(x.dtype)


if __name__ == "__main__":
    # TODO(synk): only Diffusion.time_embedding is implemented as a Pallas kernel;
    # the full UNet (convs, attention blocks, up/down-sampling) is out of scope here.
    key = jax.random.PRNGKey(0)
    B = 2
    n_embed = 64            # small (SD uses 320); hidden = 256 -> 2 N-tiles of 128
    hidden = 4 * n_embed

    k_x, k_w1, k_b1, k_w2, k_b2 = jax.random.split(key, 5)
    x = jax.random.normal(k_x, (B, n_embed), dtype=jnp.float32)

    # Deterministic PyTorch-style init: U(-1/sqrt(fan_in), 1/sqrt(fan_in))
    lim1 = 1.0 / (n_embed ** 0.5)
    lim2 = 1.0 / (hidden ** 0.5)
    w1 = jax.random.uniform(k_w1, (n_embed, hidden), jnp.float32, -lim1, lim1)
    b1 = jax.random.uniform(k_b1, (hidden,), jnp.float32, -lim1, lim1)
    w2 = jax.random.uniform(k_w2, (hidden, hidden), jnp.float32, -lim2, lim2)
    b2 = jax.random.uniform(k_b2, (hidden,), jnp.float32, -lim2, lim2)

    out = time_embedding(x, w1, b1, w2, b2)
    jax.block_until_ready(out)

    ref = time_embedding_ref(x, w1, b1, w2, b2)
    assert out.shape == (B, hidden), out.shape
    # bf16 weight streaming -> compare against the bf16-recipe reference with a
    # tolerance covering f32 accumulation-order differences.
    assert jnp.allclose(out, ref, atol=1e-2, rtol=1e-2), "mismatch vs JAX reference"

    print("KERNEL_OK")
</pallas_src>

<mosaic_0001>
module attributes {stable_mosaic.version = 11 : i64} {
  func.func @time_embedding_kernel(%arg0: i32, %arg1: memref<8x64xbf16, #tpu.memory_space<vmem>>, %arg2: memref<64x256xbf16, #tpu.memory_space<vmem>>, %arg3: memref<1x256xf32, #tpu.memory_space<vmem>>, %arg4: memref<256x128xbf16, #tpu.memory_space<vmem>>, %arg5: memref<1x128xf32, #tpu.memory_space<vmem>>, %arg6: memref<8x128xf32, #tpu.memory_space<vmem>>) attributes {dimension_semantics = [#tpu.dimension_semantics<parallel>], iteration_bounds = array<i64: 2>, scalar_prefetch = 0 : i64, scratch_operands = 0 : i64, tpu.core_type = #tpu.core_type<tc>, window_params = [{pipeline_mode = #tpu.pipeline_mode<synchronous>, transform_indices = @transform_0, window_bounds = array<i64: 8, 64>}, {pipeline_mode = #tpu.pipeline_mode<synchronous>, transform_indices = @transform_1, window_bounds = array<i64: 64, 256>}, {pipeline_mode = #tpu.pipeline_mode<synchronous>, transform_indices = @transform_2, window_bounds = array<i64: 1, 256>}, {transform_indices = @transform_3, window_bounds = array<i64: 256, 128>}, {transform_indices = @transform_4, window_bounds = array<i64: 1, 128>}, {transform_indices = @transform_5, window_bounds = array<i64: 8, 128>}]} {
    %c0 = arith.constant 0 : index
    %c0_0 = arith.constant 0 : index
    %0 = vector.load %arg1[%c0, %c0_0] : memref<8x64xbf16, #tpu.memory_space<vmem>>, vector<8x64xbf16>
    %c0_1 = arith.constant 0 : index
    %c0_2 = arith.constant 0 : index
    %1 = vector.load %arg2[%c0_1, %c0_2] : memref<64x256xbf16, #tpu.memory_space<vmem>>, vector<64x256xbf16>
    %cst = arith.constant dense<0.000000e+00> : vector<8x256xf32>
    %2 = tpu.matmul %0, %1, %cst {dimension_numbers = #tpu.dot_dimension_numbers<[1], [0], [0], [1], [0, 0, 1, 1], [], []>} : vector<8x64xbf16>, vector<64x256xbf16>, vector<8x256xf32> -> vector<8x256xf32>
    %c0_3 = arith.constant 0 : index
    %c0_4 = arith.constant 0 : index
    %3 = vector.load %arg3[%c0_3, %c0_4] : memref<1x256xf32, #tpu.memory_space<vmem>>, vector<1x256xf32>
    %4 = vector.broadcast %3 : vector<1x256xf32> to vector<8x256xf32>
    %5 = arith.addf %2, %4 : vector<8x256xf32>
    %6 = arith.negf %5 : vector<8x256xf32>
    %7 = math.exp %6 : vector<8x256xf32>
    %cst_5 = arith.constant 1.000000e+00 : f32
    %8 = vector.broadcast %cst_5 : f32 to vector<8x256xf32>
    %9 = arith.addf %8, %7 : vector<8x256xf32>
    %10 = arith.divf %8, %9 : vector<8x256xf32>
    %11 = arith.mulf %5, %10 : vector<8x256xf32>
    %12 = arith.truncf %11 : vector<8x256xf32> to vector<8x256xbf16>
    %c0_6 = arith.constant 0 : index
    %c0_7 = arith.constant 0 : index
    %13 = vector.load %arg4[%c0_6, %c0_7] : memref<256x128xbf16, #tpu.memory_space<vmem>>, vector<256x128xbf16>
    %cst_8 = arith.constant dense<0.000000e+00> : vector<8x128xf32>
    %14 = tpu.matmul %12, %13, %cst_8 {dimension_numbers = #tpu.dot_dimension_numbers<[1], [0], [0], [1], [0, 0, 1, 1], [], []>} : vector<8x256xbf16>, vector<256x128xbf16>, vector<8x128xf32> -> vector<8x128xf32>
    %c0_9 = arith.constant 0 : index
    %c0_10 = arith.constant 0 : index
    %15 = vector.load %arg5[%c0_9, %c0_10] : memref<1x128xf32, #tpu.memory_space<vmem>>, vector<1x128xf32>
    %16 = vector.broadcast %15 : vector<1x128xf32> to vector<8x128xf32>
    %17 = arith.addf %14, %16 : vector<8x128xf32>
    %c0_11 = arith.constant 0 : index
    %c0_12 = arith.constant 0 : index
    %18 = vector.load %arg6[%c0_11, %c0_12] : memref<8x128xf32, #tpu.memory_space<vmem>>, vector<8x128xf32>
    tpu.vector_store %arg6[%c0_11, %c0_12], %17 {strides = array<i32>} : memref<8x128xf32, #tpu.memory_space<vmem>>, vector<8x128xf32>,
    return
  }
  func.func @transform_0(%arg0: i32) -> (i32, i32) {
    %c0_i32 = arith.constant 0 : i32
    %c0_i32_0 = arith.constant 0 : i32
    %c0_i32_1 = arith.constant 0 : i32
    return %c0_i32, %c0_i32_0 : i32, i32
  }
  func.func @transform_1(%arg0: i32) -> (i32, i32) {
    %c0_i32 = arith.constant 0 : i32
    %c0_i32_0 = arith.constant 0 : i32
    %c0_i32_1 = arith.constant 0 : i32
    return %c0_i32, %c0_i32_0 : i32, i32
  }
  func.func @transform_2(%arg0: i32) -> (i32, i32) {
    %c0_i32 = arith.constant 0 : i32
    %c0_i32_0 = arith.constant 0 : i32
    %c0_i32_1 = arith.constant 0 : i32
    return %c0_i32, %c0_i32_0 : i32, i32
  }
  func.func @transform_3(%arg0: i32) -> (i32, i32) {
    %c0_i32 = arith.constant 0 : i32
    %c0_i32_0 = arith.constant 0 : i32
    return %c0_i32, %arg0 : i32, i32
  }
  func.func @transform_4(%arg0: i32) -> (i32, i32) {
    %c0_i32 = arith.constant 0 : i32
    %c0_i32_0 = arith.constant 0 : i32
    return %c0_i32, %arg0 : i32, i32
  }
  func.func @transform_5(%arg0: i32) -> (i32, i32) {
    %c0_i32 = arith.constant 0 : i32
    %c0_i32_0 = arith.constant 0 : i32
    return %c0_i32, %arg0 : i32, i32
  }
}

</mosaic_0001>

<bundles_post_ra>
// kernel: tpu_custom_call.1
= control target key start
LH: loop header
LB: loop body
LE: loop exit
PB: predicated region body
PF: predicated region fallthrough
CT: control target
= control target key end

     0   :  { %10 = vsyncpa [#allocation3], 0  ;;  %s1377_s0 = inlined_call_operand.hbm [shape: bf16[8,64], index: 0, kind: input, shape index: {}]   ;;  %s1378_s1 = inlined_call_operand.hbm [shape: bf16[64,256], index: 1, kind: input, shape index: {}]   ;;  %s1379_s2 = inlined_call_operand.hbm [shape: f32[1,256], index: 2, kind: input, shape index: {}]   ;;  %s1380_s3 = inlined_call_operand.hbm [shape: bf16[256,256], index: 3, kind: input, shape index: {}]   ;;  %s1381_s4 = inlined_call_operand.vmem [shape: f32[1,256], index: 4, kind: input, shape index: {}]   ;;  %s1382_s5 = inlined_call_operand.hbm [shape: f32[8,256], index: 5, kind: output, shape index: {}]  }
   0x1   :  { %11 = vsyncpa [#allocation6], 0 }
   0x2   :  { %12 = vsyncpa [#allocation9], 0 }
   0x3   :  { %14 = vsyncpa [#allocation9 + $0x1], 0 }
   0x4   :  { %15 = vsyncpa [#allocation4], 0 }
   0x5   :  { %17 = vsyncpa [#allocation4 + $0x1], 0  ;;  %s1182_s18 = smov 0   ;;  %s1184_s19 = smov 0  }
   0x6   :  { %s1186_s20 = smov 0   ;;  %s1188_s21 = smov 0  }
   0x7 LB: > { %s1203_s22 = sadd.s32 4294967295, %s1143_s21   ;;  %s717_s23 = sadd.s32 4294967294, %s1143_s21   ;;  %s1143_s21 = sphi %s1188_s21, %s1393_s21   ;;  %s1139_s20 = sphi %s1186_s20, %s1392_s20   ;;  %s1135_s19 = sphi %s1184_s19, %s1391_s19   ;;  %s1131_s18 = sphi %s1182_s18, %s1390_s18  }
   0x8   : > { %p106_p0 = scmp.ne.s32.totalorder %s1135_s19, %s1131_s18  ;;  %p107_p1 = scmp.eq.s32.totalorder %s1203_s22, 0 }
   0x9   : > { %p156_p2 = scmp.eq.s32.totalorder %s1203_s22, 1  ;;  %p162_p3 = scmp.eq.s32.totalorder %s717_s23, 1 }
   0xa   : > { %p1212_p4 = por %p107_p1, %p106_p0  ;;  %p718_p5 = scmp.ge.s32.totalorder %s1143_s21, 1 }
   0xb   : > { %p1217_p6 = por %p162_p3, %p106_p0  ;;  %p169_p7 = scmp.lt.s32.totalorder %s1143_s21, 3 }
   0xc   : > { %s192_s28 = sshll.u32 %s1378_s1, 4  ;;  %s1145_s30 = smov [#allocation5]   ;;  %s193_s28 = int_to_ptr.hbm [resolvable:$true] %s192_s28 }
   0xd   : > { %p1225_p8 = pnand %p718_p5, %p169_p7  ;;  %s194_s6 = sshll.u32 %s1145_s30, 4  ;;  %s195_s6 = int_to_ptr.vmem [resolvable:$true] %s194_s6 }
   0xe   : > { %s181_s10 = sshll.u32 %s1377_s0, 4  ;;  %s1146_s11 = smov 128   ;;  %s182_s10 = int_to_ptr.hbm [resolvable:$true] %s181_s10 }
   0xf   : > { %p875_p9 = pneg %p1225_p8  ;;  %s1147_s12 = smov 8  }
  0x10   : > { %s1148_s13 = smov [#allocation2]   ;;  %s207_s17 = sshll.u32 %s1379_s2, 4  ;;  %s208_s17 = int_to_ptr.hbm [resolvable:$true] %s207_s17 }
  0x11   : > { %p1233_p10 = pnand %p875_p9, %p107_p1  ;;  %s183_s14 = sshll.u32 %s1148_s13, 4  ;;  %s184_s14 = int_to_ptr.vmem [resolvable:$true] %s183_s14 }
  0x12   : > { %s1149_s23 = smov [#allocation7]   ;;  %s1251_s27 = sadd.s32 1, %s1143_s21  }
  0x13   : > { %881 = dma.hbm_to_vmem [thread:$0]  (!%p1233_p10), %s193_s28, 1024, %s195_s6, [#allocation6], %s1146_s11, %s1146_s11, %s1147_s12  }
  0x14   : > { %878 = dma.hbm_to_vmem [thread:$0]  (!%p1233_p10), %s182_s10, 64, %s184_s14, [#allocation3]  }
  0x15   : > { %s209_s26 = sshll.u32 %s1149_s23, 4  ;;  %s90_s28 = ssub.s32 %s1143_s21, %s1251_s27  ;;  %s210_s26 = int_to_ptr.vmem [resolvable:$true] %s209_s26 }
  0x16   : > { %884 = dma.hbm_to_vmem [thread:$0]  (!%p1233_p10), %s208_s17, 32, %s210_s26, [#allocation6]  }
  0x17   : > { %s93_s30 = sadd.s32 1, %s1139_s20  ;;  %p91_p12 = scmp.eq.s32.totalorder %s90_s28, 0 }
  0x18   : > { %p100_p13 = scmp.ne.s32.totalorder %s1139_s20, %s1135_s19  ;;  %p101_p0 = scmp.eq.s32.totalorder %s1143_s21, 0 }
  0x19   : > { %p896_p3 = scmp.lt.s32.totalorder %s1143_s21, 2  ;;  %s220_s9 = sand.u32 1, %s1139_s20  }
  0x1a   : > { %s1263_s6 = scalar_select %p91_p12, %s1139_s20, %s93_s30  }
  0x1b   : > { %p102_p5 = por %p101_p0, %p100_p13  ;;  %p1267_p7 = por %p156_p2, %p100_p13 }
  0x1c   : > { %s724_s10 = sshll.u32 %s1143_s21, 2  ;;  %s723_s7 = sshll.u32 %s220_s9, 7 }
  0x1d   : > { %s228_s14 = scalar_lea.hbm %s1380_s3, %s724_s10  ;;  %s224_s16 = scalar_lea.vmem [#allocation8], %s723_s7 }
  0x1e   : > { %s229_s15 = sshll.u32 %s228_s14, 4  ;;  %s231_s17 = sshll.u32 %s224_s16, 4  ;;  %s230_s15 = int_to_ptr.hbm [resolvable:$true] %s229_s15  ;;  %s232_s17 = int_to_ptr.vmem [resolvable:$true] %s231_s17 }
  0x1f   : > { %p1278_p9 = pnand %p896_p3, %p102_p5  ;;  %s221_s26 = scalar_lea.sflag [#allocation9], %s220_s9 }
  0x20   : > { %s1039_s28 = sshra.s32 %s230_s15, 4  ;;  %s1046_s12 = scalar_lea.hbm %s1380_s3, 256  ;;  %s1040_s28 = int_to_ptr.hbm [resolvable:$true] %s1039_s28 }
  0x21   : > { %s1041_s30 = scalar_lea.hbm %s1040_s28, 128  ;;  %p1043_p10 = pneg %p1278_p9 }
  0x22   : > { %p1042_p2 = scmp.ne.s32.totalorder %s1040_s28, %s1041_s30  ;;  %p1047_p0 = scmp.lt.s32.totalorder %s1040_s28, %s1380_s3 }
  0x23   : > { %p1048_p3 = scmp.lt.s32.totalorder %s1046_s12, %s1041_s30 }
  0x24   : > { %p1044_p12 = pnand %p1043_p10, %p1042_p2 }
  0x25   : > { %p1049_p5 = por %p1048_p3, %p1047_p0 }
  0x26   : > { %p1045_p13 = pneg %p1044_p12 }
  0x28   : > { %p1050_p11 = pnand %p1049_p5, %p1045_p13 }
  0x2a   : > { %1053 = shalt.err (!%p1050_p11)
}
  0x2b   : > { %s1150_s9 = smov 64   ;;  %s1151_s16 = smov 4  }
  0x2c   : > { %888 = dma.hbm_to_vmem [thread:$0]  (!%p1278_p9), %s230_s15, 2048, %s232_s17, %s221_s26, %s1146_s11, %s1150_s9, %s1151_s16  }
  0x2d   : > { %249 = sbr.rel (%p1225_p8) target bundleno = 376 (0x178), region = 40 }
  0x32   : > { %1114 = dma.done.wait (%p107_p1), [#allocation3], 64  }
  0x33   : > { %1116 = vsyncadd (%p107_p1), [#allocation3], 4294967232 }
  0x34   : > { %1118 = dma.done.wait (%p107_p1), [#allocation6], 1056  }
  0x35   : > { %1120 = vsyncadd (%p107_p1), [#allocation6], 4294966240  ;;  %s1304_s23 = sand.u32 1, %s1135_s19  }
  0x36   : > { %s729_s29 = sshll.u32 %s1304_s23, 7  ;;  %s267_s11 = scalar_lea.sflag [#allocation9], %s1304_s23 }
  0x37   : > { %s1308_s15 = scalar_lea.vmem [#allocation8], %s729_s29 }
  0x38   : > { %1122 = dma.done.wait (%p1212_p4), %s267_s11, 2048  }
  0x39   : > { %1124 = vsyncadd (%p1212_p4), %s267_s11, 4294965248  ;;  %v757_v0 = vld [vmem:[#allocation5 + $0x30] sm:$0xf]  ;;  %v842_v1 = vld [vmem:[#allocation5 + $0x34] sm:$0xf0]  ;;  %vm360_vm0 = vcmask 523264  }
  0x3a   : > { %v841_v2 = vld [vmem:[#allocation5 + $0x34] sm:$0xf]  ;;  %v758_v3 = vor.u32 %v842_v1, %v757_v0  ;;  %v759_v4 = vld [vmem:[#allocation5 + $0x38] sm:$0xf0]  ;;  %v749_v5 = vld [vmem:[#allocation5 + $0x20] sm:$0xf] }
  0x3b   : > { %v840_v6 = vld [vmem:[#allocation5 + $0x24] sm:$0xf0]  ;;  %v762_v7 = vor.u32 %v841_v2, %v759_v4  ;;  %v839_v8 = vld [vmem:[#allocation5 + $0x24] sm:$0xf]  ;;  %v751_v9 = vld [vmem:[#allocation5 + $0x28] sm:$0xf0] }
  0x3c   : > { %368 = vmatpush.bf16.msra.mxu0 %v758_v3  ;;  %v750_v10 = vor.u32 %v840_v6, %v749_v5  ;;  %v754_v11 = vor.u32 %v839_v8, %v751_v9  ;;  %v741_v12 = vld [vmem:[#allocation5 + $0x10] sm:$0xf]  ;;  %v838_v13 = vld [vmem:[#allocation5 + $0x14] sm:$0xf0]  ;;  %v837_v14 = vld [vmem:[#allocation5 + $0x14] sm:$0xf] }
  0x3d   : > { %381 = vmatpush.bf16.msra.mxu1 %v762_v7  ;;  %v743_v15 = vld [vmem:[#allocation5 + $0x18] sm:$0xf0]  ;;  %v742_v16 = vor.u32 %v838_v13, %v741_v12  ;;  %v733_v18 = vld [vmem:[#allocation5] sm:$0xf]  ;;  %v836_v19 = vld [vmem:[#allocation5 + $0x4] sm:$0xf0] }
  0x3e   : > { %v746_v17 = vor.u32 %v837_v14, %v743_v15  ;;  %v835_v20 = vld [vmem:[#allocation5 + $0x4] sm:$0xf]  ;;  %v735_v21 = vld [vmem:[#allocation5 + $0x8] sm:$0xf0]  ;;  %v734_v22 = vor.u32 %v836_v19, %v733_v18  ;;  %v305_v24 = vld [vmem:[#allocation2] sm:$0xf] }
  0x3f   : > { %v738_v23 = vor.u32 %v835_v20, %v735_v21  ;;  %p301_p1 = scmp.lt.s32.totalorder %s1203_s22, 1  ;;  %v850_v25 = vld [vmem:[%s1308_s15 + $0x38] sm:$0xff]  ;;  %v849_v27 = vld [vmem:[%s1308_s15 + $0x30] sm:$0xff]  ;;  %v848_v29 = vld [vmem:[%s1308_s15 + $0x28] sm:$0xff]  ;;  %s730_s30 = sshll.u32 %s1304_s23, 3 }
  0x40   : > { %369 = vmatpush.bf16.msra.mxu0 %v750_v10  ;;  %v858_v26 = vld [vmem:[%s1308_s15 + $0x78] sm:$0xff]  ;;  %564 = vmatpush.bf16.msra.mxu2 %v850_v25  ;;  %v857_v28 = vld [vmem:[%s1308_s15 + $0x70] sm:$0xff]  ;;  %v856_v30 = vld [vmem:[%s1308_s15 + $0x68] sm:$0xff]  ;;  %s832_s10 = sshll.u32 %s1203_s22, 3  ;;  %s300_s16 = scalar_lea.vmem [#allocation10], %s730_s30 }
  0x41   : > { %382 = vmatpush.bf16.msra.mxu1 %v754_v11  ;;  %s1316_s24 = scalar_select %p301_p1, %s1203_s22, 1  ;;  %577 = vmatpush.bf16.msra.mxu3 %v858_v26  ;;  %v847_v31 = vld [vmem:[%s1308_s15 + $0x20] sm:$0xff]  ;;  %v846_v33 = vld [vmem:[%s1308_s15 + $0x18] sm:$0xff]  ;;  %v845_v35 = vld [vmem:[%s1308_s15 + $0x10] sm:$0xff] }
  0x42   : > { %v855_v32 = vld [vmem:[%s1308_s15 + $0x60] sm:$0xff]  ;;  %v854_v34 = vld [vmem:[%s1308_s15 + $0x58] sm:$0xff]  ;;  %v853_v36 = vld [vmem:[%s1308_s15 + $0x50] sm:$0xff]  ;;  %s602_s9 = scalar_lea.hbm %s1382_s5, %s832_s10  ;;  %s604_s29 = sshll.u32 %s300_s16, 4  ;;  %s605_s29 = int_to_ptr.vmem [resolvable:$true] %s604_s29 }
  0x43   : > { %s303_s28 = scalar_lea.vmem %s1381_s4, %s1316_s24  ;;  %v844_v37 = vld [vmem:[%s1308_s15 + $0x8] sm:$0xff]  ;;  %v314_v39 = vld [vmem:[#allocation7] sm:$0x3]  ;;  %v843_v41 = vld [vmem:[%s1308_s15] sm:$0xff]  ;;  %s606_s11 = sshll.u32 %s602_s9, 4  ;;  %s607_s11 = int_to_ptr.hbm [resolvable:$true] %s606_s11 }
  0x44   : > { %370 = vmatpush.bf16.msra.mxu0 %v742_v16  ;;  %565 = vmatpush.bf16.msra.mxu2 %v849_v27  ;;  %v852_v38 = vld [vmem:[%s1308_s15 + $0x48] sm:$0xff]  ;;  %v316_v40 = vperm.slane %v314_v39, 0  ;;  %v851_v42 = vld [vmem:[%s1308_s15 + $0x40] sm:$0xff]  ;;  %v317_v43 = vperm.slane %v314_v39, 1  ;;  %v940_v16 = vld [vmem:[%s303_s28] ss:$0 sm:$0xff] }
  0x45   : > { %383 = vmatpush.bf16.msra.mxu1 %v746_v17  ;;  %578 = vmatpush.bf16.msra.mxu3 %v857_v28  ;;  %s592_s22 = scalar_lea.sflag [#allocation4], %s1304_s23  ;;  %s1083_s15 = sshra.s32 %s607_s11, 4  ;;  %s1084_s15 = int_to_ptr.hbm [resolvable:$true] %s1083_s15 }
  0x46   : > { %s1085_s24 = scalar_lea.hbm %s1084_s15, 8  ;;  %s1089_s28 = scalar_lea.hbm %s1382_s5, 16 }
  0x47   : > { %p1086_p4 = scmp.ne.s32.totalorder %s1084_s15, %s1085_s24  ;;  %p1090_p9 = scmp.lt.s32.totalorder %s1084_s15, %s1382_s5 }
  0x48   : > { %371 = vmatpush.bf16.msra.mxu0 %v734_v22  ;;  %566 = vmatpush.bf16.msra.mxu2 %v848_v29  ;;  %p1091_p2 = scmp.lt.s32.totalorder %s1089_s28, %s1085_s24 }
  0x49   : > { %384 = vmatpush.bf16.msra.mxu1 %v738_v23  ;;  %579 = vmatpush.bf16.msra.mxu3 %v856_v30  ;;  %p1087_p8 = pnand %p1086_p4, %p1267_p7 }
  0x4a   : > { %p1092_p10 = por %p1091_p2, %p1090_p9 }
  0x4b   : > { %763 = vmatmul.msk.bf16.vlgmr.msra.gmra.mxu0 %vm360_vm0, %v305_v24  ;;  %p1088_p11 = pneg %p1087_p8 }
  0x4c   : > { %764 = vmatmul.msk.bf16.vlgmr.msra.gmra.mxu1 %vm360_vm0, %v305_v24  ;;  %567 = vmatpush.bf16.msra.mxu2 %v847_v31 }
  0x4d   : > { %580 = vmatpush.bf16.msra.mxu3 %v855_v32  ;;  %p1093_p12 = pnand %p1092_p10, %p1088_p11 }
  0x50   : > { %568 = vmatpush.bf16.msra.mxu2 %v846_v33 }
  0x51   : > { %581 = vmatpush.bf16.msra.mxu3 %v854_v34 }
  0x54   : > { %569 = vmatpush.bf16.msra.mxu2 %v845_v35 }
  0x55   : > { %582 = vmatpush.bf16.msra.mxu3 %v853_v36 }
  0x58   : > { %570 = vmatpush.bf16.msra.mxu2 %v844_v37 }
  0x59   : > { %583 = vmatpush.bf16.msra.mxu3 %v852_v38 }
  0x5c   : > { %571 = vmatpush.bf16.msra.mxu2 %v843_v41 }
  0x5d   : > { %584 = vmatpush.bf16.msra.mxu3 %v851_v42 }
  0xc8   : > { %v373_v44 = vpop.f32.mrf.mxu0 }
  0xc9   : > { %v374_v45 = vadd.f32 %v373_v44, %v316_v40  ;;  %v386_v46 = vpop.f32.mrf.mxu1 }
  0xca   : > { %v387_v47 = vadd.f32 %v386_v46, %v317_v43 }
  0xcb   : > { %v765_v48 = vmul.f32 -1.442695, %v374_v45 }
  0xcc   : > { %v766_v49 = vmul.f32 -1.442695, %v387_v47 }
  0xcd   : > { %941 = vpow2.f32 %v765_v48 }
  0xce   : > { %943 = vpow2.f32 %v766_v49 }
  0xd0   : > { %v375_v50 = vpop.f32.mrf.mxu0 }
  0xd1   : > { %v388_v51 = vpop.f32.mrf.mxu1 }
  0xd3   : > { %v942_v52 = vpop.eup %941 }
  0xd4   : > { %v944_v53 = vpop.eup %943  ;;  %v396_v54 = vadd.f32 1.0, %v942_v52 }
  0xd5   : > { %v397_v55 = vadd.f32 1.0, %v944_v53 }
  0xd6   : > { %945 = vrcp.f32 %v396_v54  ;;  %v409_v61 = vand.u32 2147483648, %v396_v54  ;;  %v407_v0 = vand.u32 2147483647, %v396_v54  ;;  %vm403_vm3 = vweird.f32 %v396_v54 }
  0xd7   : > { %947 = vrcp.f32 %v397_v55  ;;  %v424_v1 = vand.u32 2147483648, %v397_v55  ;;  %v422_v3 = vand.u32 2147483647, %v397_v55  ;;  %vm418_vm5 = vweird.f32 %v397_v55 }
  0xd8   : > { %v410_v5 = vor.u32 1.1754944e-38, %v409_v61  ;;  %vm408_vm6 = vcmp.eq.f32.partialorder %v407_v0, 8.507059e+37 }
  0xd9   : > { %v425_v8 = vor.u32 1.1754944e-38, %v424_v1  ;;  %vm423_vm8 = vcmp.eq.f32.partialorder %v422_v3, 8.507059e+37 }
  0xdc   : > { %v946_v56 = vpop.eup %945 }
  0xdd   : > { %v948_v57 = vpop.eup %947  ;;  %v399_v58 = vmul.f32 %v946_v56, %v396_v54  ;;  %vm404_vm1 = vweird.f32 %v946_v56 }
  0xde   : > { %v414_v59 = vmul.f32 %v948_v57, %v397_v55  ;;  %vm419_vm2 = vweird.f32 %v948_v57  ;;  %vm405_vm4 = vmor %vm403_vm3, %vm404_vm1 }
  0xdf   : > { %v400_v60 = vsub.f32 1.0, %v399_v58  ;;  %vm420_vm7 = vmor %vm418_vm5, %vm419_vm2 }
  0xe0   : > { %v415_v62 = vsub.f32 1.0, %v414_v59 }
  0xe1   : > { %v401_v63 = vmul.f32 %v946_v56, %v400_v60 }
  0xe2   : > { %v416_v2 = vmul.f32 %v948_v57, %v415_v62 }
  0xe3   : > { %v402_v4 = vadd.f32 %v946_v56, %v401_v63 }
  0xe4   : > { %v417_v6 = vadd.f32 %v948_v57, %v416_v2 }
  0xe5   : > { %v406_v7 = vsel %vm405_vm4, %v946_v56, %v402_v4 }
  0xe6   : > { %v411_v9 = vsel %vm408_vm6, %v410_v5, %v406_v7  ;;  %v421_v10 = vsel %vm420_vm7, %v948_v57, %v417_v6 }
  0xe7   : > { %v428_v11 = vmul.f32 %v411_v9, %v374_v45  ;;  %v426_v12 = vsel %vm423_vm8, %v425_v8, %v421_v10 }
  0xe8   : > { %v429_v13 = vmul.f32 %v426_v12, %v387_v47 }
  0xe9   : > { %v430_v14 = vpack.c.bf16 %v428_v11, %v428_v11 }
  0xea   : > { %v431_v15 = vpack.c.bf16 %v429_v13, %v429_v13 }
  0xeb   : > { %572 = vmatmul.bf16.vlgmr.msra.gmra.mxu2 %v430_v14 }
  0xec   : > { %585 = vmatmul.bf16.vlgmr.msra.gmra.mxu3 %v431_v15 }
 0x16e   : > { %v573_v17 = vpop.f32.mrf.mxu2 }
 0x16f   : > { %v574_v18 = vadd.f32 %v940_v16, %v573_v17  ;;  %v586_v19 = vpop.f32.mrf.mxu3 }
 0x171   : > { %v587_v20 = vadd.f32 %v586_v19, %v574_v18 }
 0x173   : > { %590 = vst [vmem:[%s300_s16] sm:$0xff] %v587_v20 }
 0x174   : > { %1096 = shalt.err (!%p1093_p12)
}
 0x175   : > { %873 = dma.vmem_to_hbm [thread:$0]  (%p1267_p7), %s605_s29, 128, %s607_s11, %s592_s22  }
 0x176   : > { %v575_v21 = vpop.f32.mrf.mxu2 }
 0x177   : > { %v588_v22 = vpop.f32.mrf.mxu3 }
 0x178 PF: > { %s618_s23 = sand.u32 1, %s1131_s18   ;;  %p1389_p13 = scmp.ge.s32.totalorder %s1143_s21, 2 }
 0x179   : > { %s619_s7 = scalar_lea.sflag [#allocation4], %s618_s23 }
 0x17a   : > { %p890_p0 = pnand %p1389_p13, %p1217_p6 }
 0x17c   : > { %p891_p3 = pneg %p890_p0 }
 0x17e   : > { %1126 = dma.done.wait (%p891_p3), %s619_s7, 128  }
 0x17f   : > { %1128 = vsyncadd (%p891_p3), %s619_s7, 4294967168  ;;  %p20_p7 = scmp.ge.s32.totalorder %s1251_s27, 4   ;;  %s1390_s18 = smov %s1135_s19 }
 0x180   : > { %s1391_s19 = smov %s1139_s20  ;;  %s1392_s20 = smov %s1263_s6 }
 0x181   : > { %s1393_s21 = smov %s1251_s27  ;;  %22 = sbr.rel (!%p20_p7) target bundleno = 7 (0x7), region = 101 }
 0x186   :  { %625 = vsyncpa [#allocation3], 1 }
 0x187   :  { %627 = vsyncpa [#allocation3 + $0x1], 1 }
 0x188   :  { %628 = vsyncpa [#allocation6], 1 }
 0x189   :  { %629 = vsyncpa [#allocation9], 1 }
 0x18a   :  { %631 = vsyncpa [#allocation9 + $0x1], 1 }
 0x18b   :  { %632 = vsyncpa [#allocation4], 1 }
 0x18c   :  { %634 = vsyncpa [#allocation4 + $0x1], 1 }

</bundles_post_ra>
